<compile_context>
chip_gen: v7x
topology: tpu7x:2x2x1
jax: 0.10.0
libtpu: 0.0.40
codegen_flags: <defaults>
</compile_context>

<pallas_src>
import math
import numpy as np
import jax
import jax.numpy as jnp
from jax.experimental import pallas as pl
from jax.experimental.pallas import tpu as pltpu


# ----------------------------------------------------------------------------
# Config mirroring the PyTorch module's `args`
# ----------------------------------------------------------------------------
class Args:
    zdim = 4                 # unused in forward
    input_size = 32
    output_size = 2
    input_dim = 2
    hyper_dims = "64-32"     # hyper-network MLP dims; last one is n_out
    dims = "8-8"             # target-network dims


def _round_up(v, m):
    return (v + m - 1) // m * m


# ----------------------------------------------------------------------------
# Deterministic parameter construction (PyTorch nn.Linear default init)
# ----------------------------------------------------------------------------
def _linear_params(key, fan_in, fan_out, dtype=jnp.float32):
    kw, kb = jax.random.split(key)
    bound = 1.0 / math.sqrt(fan_in)
    # stored as (in, out) so the forward does h @ W + b
    w = jax.random.uniform(kw, (fan_in, fan_out), dtype, minval=-bound, maxval=bound)
    b = jax.random.uniform(kb, (1, fan_out), dtype, minval=-bound, maxval=bound)
    return w, b


def build_params(args, key):
    hyper_dims = tuple(map(int, args.hyper_dims.split("-")))
    n_out = hyper_dims[-1]

    # --- self.model : Linear / ReLU stack ---
    mlp = []
    prev = args.input_size
    for d in hyper_dims:
        key, sub = jax.random.split(key)
        mlp.append(_linear_params(sub, prev, d))
        prev = d

    # --- self.output : list of Linear(n_out, out_j) heads, same order as torch
    head_out_dims = []
    tdims = tuple(map(int, args.dims.split("-")))
    for k in range(len(tdims)):
        if k == 0:
            head_out_dims.append(args.input_dim * tdims[k])
        else:
            head_out_dims.append(tdims[k - 1] * tdims[k])
        head_out_dims += [tdims[k]] * 4
    head_out_dims.append(tdims[-1] * args.output_size)
    head_out_dims += [args.output_size] * 4

    head_ws, head_bs = [], []
    for od in head_out_dims:
        key, sub = jax.random.split(key)
        w, b = _linear_params(sub, n_out, od)
        head_ws.append(w)
        head_bs.append(b)

    # fuse all heads: concat along output-feature axis (== torch.cat dim=1)
    w_out = jnp.concatenate(head_ws, axis=1)          # (n_out, total_out)
    b_out = jnp.concatenate(head_bs, axis=1)          # (1, total_out)
    return mlp, (w_out, b_out)


# ----------------------------------------------------------------------------
# Host-side folding / padding / casting (all exact transformations)
# ----------------------------------------------------------------------------
def prepare_fused_params(mlp_params, out_params, *, hid_pad=128, out_pad=128,
                         compute_dtype=jnp.bfloat16):
    w_heads, b_heads = out_params

    # Fold the last (un-activated) MLP layer into the fused head matmul.
    w_last, b_last = mlp_params[-1]
    w_fused = w_last @ w_heads                   # (prev_hidden, total_out)
    b_fused = b_last @ w_heads + b_heads         # (1, total_out)

    ws = [w for w, _ in mlp_params[:-1]] + [w_fused]
    bs = [b for _, b in mlp_params[:-1]] + [b_fused]

    # Zero-pad feature dims to lane multiples; padded hidden columns stay
    # exactly zero through ReLU (bias padded with 0), padded rows of the next
    # weight contribute zero, so results are bit-identical up to fp order.
    padded_ws, padded_bs = [], []
    extra_rows = 0
    for i, (w, b) in enumerate(zip(ws, bs)):
        is_last = (i == len(ws) - 1)
        out_dim = int(w.shape[1])
        target = _round_up(out_dim, out_pad if is_last else hid_pad)
        w_p = jnp.pad(w, ((0, extra_rows), (0, target - out_dim)))
        b_p = jnp.pad(b, ((0, 0), (0, target - out_dim)))
        padded_ws.append(w_p.astype(compute_dtype))     # weights -> bf16 (MXU)
        padded_bs.append(b_p.astype(jnp.float32))       # biases stay f32
        extra_rows = target - out_dim

    return padded_ws, padded_bs


# ----------------------------------------------------------------------------
# Pallas kernel: n_act ReLU-activated layers + one fused output matmul
# ----------------------------------------------------------------------------
def make_kernel(n_act):
    def kernel(*refs):
        x_ref = refs[0]
        out_ref = refs[-1]
        params = refs[1:-1]           # (w0,b0, ..., w_fused, b_fused)

        h = x_ref[...]                # bf16 batch tile
        for k in range(n_act):
            w = params[2 * k][...]
            b = params[2 * k + 1][...]
            # MXU in bf16, accumulate f32; bias-add / ReLU on the f32 accumulator
            h = jnp.dot(h, w, preferred_element_type=jnp.float32) + b
            h = jnp.maximum(h, 0.0)
            h = h.astype(w.dtype)     # back to bf16 for the next MXU pass

        w_f = params[-2][...]
        b_f = params[-1][...]
        out = jnp.dot(h, w_f, preferred_element_type=jnp.float32) + b_f
        out_ref[...] = out.astype(out_ref.dtype)

    return kernel


# ----------------------------------------------------------------------------
# Wrapper: batch-gridded pallas_call with VMEM-resident weights
# ----------------------------------------------------------------------------
def hyperflow_forward(x, mlp_params, out_params, *, compute_dtype=jnp.bfloat16,
                      batch_tile=256):
    total_out_orig = int(out_params[0].shape[1])
    ws, bs = prepare_fused_params(mlp_params, out_params,
                                  compute_dtype=compute_dtype)
    total_out_pad = int(ws[-1].shape[1])
    n_act = len(ws) - 1

    B, in_size = x.shape
    # Batch tile: 256 rows for real workloads; for tiny B pad to a sublane
    # multiple and run a single grid step.
    TB = batch_tile if B >= batch_tile else _round_up(max(B, 1), 8)
    B_pad = _round_up(B, TB)
    x_p = jnp.pad(x, ((0, B_pad - B), (0, 0))).astype(compute_dtype)

    flat_params = []
    for w, b in zip(ws, bs):
        flat_params += [w, b]

    grid = (B_pad // TB,)

    def pinned(shape):
        # constant block index -> weights/biases stay resident across grid steps
        return pl.BlockSpec(shape, lambda i: (0,) * len(shape))

    in_specs = [pl.BlockSpec((TB, in_size), lambda i: (i, 0))]
    in_specs += [pinned(tuple(int(d) for d in p.shape)) for p in flat_params]
    out_spec = pl.BlockSpec((TB, total_out_pad), lambda i: (i, 0))

    # Advisory cost estimate so XLA schedules around this tiny custom call.
    flops = 0
    prev = in_size
    for w in ws:
        flops += 2 * B_pad * prev * int(w.shape[1])
        prev = int(w.shape[1])
    bytes_accessed = (
        int(x_p.size) * x_p.dtype.itemsize
        + sum(int(p.size) * p.dtype.itemsize for p in flat_params)
        + B_pad * total_out_pad * 4
    )

    out_padded = pl.pallas_call(
        make_kernel(n_act),
        out_shape=jax.ShapeDtypeStruct((B_pad, total_out_pad), jnp.float32),
        grid_spec=pltpu.PrefetchScalarGridSpec(
            num_scalar_prefetch=0,
            grid=grid,
            in_specs=in_specs,
            out_specs=out_spec,
        ),
        compiler_params=pltpu.CompilerParams(
            dimension_semantics=("parallel",),
        ),
        cost_estimate=pl.CostEstimate(
            flops=flops, transcendentals=0, bytes_accessed=bytes_accessed),
    )(x_p, *flat_params)

    # Slice back to the true batch / output widths.
    return out_padded[:B, :total_out_orig]


# ----------------------------------------------------------------------------
# Plain-JAX reference (mirrors the PyTorch forward exactly, pure f32)
# ----------------------------------------------------------------------------
def reference_forward(x, mlp_params, out_params):
    h = x
    for k, (w, b) in enumerate(mlp_params):
        h = h @ w + b
        if k < len(mlp_params) - 1:
            h = jnp.maximum(h, 0.0)
    w_out, b_out = out_params
    return h @ w_out + b_out


# ----------------------------------------------------------------------------
if __name__ == "__main__":
    args = Args()
    key = jax.random.PRNGKey(0)
    key, pkey, xkey = jax.random.split(key, 3)

    mlp_params, out_params = build_params(args, pkey)

    B = 2
    x = jax.random.normal(xkey, (B, args.input_size), dtype=jnp.float32)

    y = hyperflow_forward(x, mlp_params, out_params)
    y = jax.block_until_ready(y)

    y_ref = reference_forward(x, mlp_params, out_params)
    assert y.shape == y_ref.shape
    # bf16 MXU inputs -> loose tolerance vs the pure-f32 reference.
    np.testing.assert_allclose(np.asarray(y), np.asarray(y_ref),
                               rtol=2e-2, atol=2e-2)

    print("KERNEL_OK")
</pallas_src>

<mosaic_0001>
module attributes {stable_mosaic.version = 11 : i64} {
  func.func @kernel(%arg0: i32, %arg1: memref<8x32xbf16, #tpu.memory_space<vmem>>, %arg2: memref<32x128xbf16, #tpu.memory_space<vmem>>, %arg3: memref<1x128xf32, #tpu.memory_space<vmem>>, %arg4: memref<128x256xbf16, #tpu.memory_space<vmem>>, %arg5: memref<1x256xf32, #tpu.memory_space<vmem>>, %arg6: memref<8x256xf32, #tpu.memory_space<vmem>>) attributes {dimension_semantics = [#tpu.dimension_semantics<parallel>], iteration_bounds = array<i64: 1>, scalar_prefetch = 0 : i64, scratch_operands = 0 : i64, tpu.core_type = #tpu.core_type<tc>, window_params = [{transform_indices = @transform_0, window_bounds = array<i64: 8, 32>}, {pipeline_mode = #tpu.pipeline_mode<synchronous>, transform_indices = @transform_1, window_bounds = array<i64: 32, 128>}, {pipeline_mode = #tpu.pipeline_mode<synchronous>, transform_indices = @transform_2, window_bounds = array<i64: 1, 128>}, {pipeline_mode = #tpu.pipeline_mode<synchronous>, transform_indices = @transform_3, window_bounds = array<i64: 128, 256>}, {pipeline_mode = #tpu.pipeline_mode<synchronous>, transform_indices = @transform_4, window_bounds = array<i64: 1, 256>}, {transform_indices = @transform_5, window_bounds = array<i64: 8, 256>}]} {
    %c0 = arith.constant 0 : index
    %c0_0 = arith.constant 0 : index
    %0 = vector.load %arg1[%c0, %c0_0] : memref<8x32xbf16, #tpu.memory_space<vmem>>, vector<8x32xbf16>
    %c0_1 = arith.constant 0 : index
    %c0_2 = arith.constant 0 : index
    %1 = vector.load %arg2[%c0_1, %c0_2] : memref<32x128xbf16, #tpu.memory_space<vmem>>, vector<32x128xbf16>
    %c0_3 = arith.constant 0 : index
    %c0_4 = arith.constant 0 : index
    %2 = vector.load %arg3[%c0_3, %c0_4] : memref<1x128xf32, #tpu.memory_space<vmem>>, vector<1x128xf32>
    %cst = arith.constant dense<0.000000e+00> : vector<8x128xf32>
    %3 = tpu.matmul %0, %1, %cst {dimension_numbers = #tpu.dot_dimension_numbers<[1], [0], [0], [1], [0, 0, 1, 1], [], []>} : vector<8x32xbf16>, vector<32x128xbf16>, vector<8x128xf32> -> vector<8x128xf32>
    %4 = vector.broadcast %2 : vector<1x128xf32> to vector<8x128xf32>
    %5 = arith.addf %3, %4 : vector<8x128xf32>
    %cst_5 = arith.constant 0.000000e+00 : f32
    %6 = vector.broadcast %cst_5 : f32 to vector<8x128xf32>
    %7 = arith.maximumf %5, %6 : vector<8x128xf32>
    %8 = arith.truncf %7 : vector<8x128xf32> to vector<8x128xbf16>
    %c0_6 = arith.constant 0 : index
    %c0_7 = arith.constant 0 : index
    %9 = vector.load %arg4[%c0_6, %c0_7] : memref<128x256xbf16, #tpu.memory_space<vmem>>, vector<128x256xbf16>
    %c0_8 = arith.constant 0 : index
    %c0_9 = arith.constant 0 : index
    %10 = vector.load %arg5[%c0_8, %c0_9] : memref<1x256xf32, #tpu.memory_space<vmem>>, vector<1x256xf32>
    %cst_10 = arith.constant dense<0.000000e+00> : vector<8x256xf32>
    %11 = tpu.matmul %8, %9, %cst_10 {dimension_numbers = #tpu.dot_dimension_numbers<[1], [0], [0], [1], [0, 0, 1, 1], [], []>} : vector<8x128xbf16>, vector<128x256xbf16>, vector<8x256xf32> -> vector<8x256xf32>
    %12 = vector.broadcast %10 : vector<1x256xf32> to vector<8x256xf32>
    %13 = arith.addf %11, %12 : vector<8x256xf32>
    %c0_11 = arith.constant 0 : index
    %c0_12 = arith.constant 0 : index
    %14 = vector.load %arg6[%c0_11, %c0_12] : memref<8x256xf32, #tpu.memory_space<vmem>>, vector<8x256xf32>
    tpu.vector_store %arg6[%c0_11, %c0_12], %13 {strides = array<i32>} : memref<8x256xf32, #tpu.memory_space<vmem>>, vector<8x256xf32>,
    return
  }
  func.func @transform_0(%arg0: i32) -> (i32, i32) {
    %c0_i32 = arith.constant 0 : i32
    %c0_i32_0 = arith.constant 0 : i32
    return %arg0, %c0_i32 : i32, i32
  }
  func.func @transform_1(%arg0: i32) -> (i32, i32) {
    %c0_i32 = arith.constant 0 : i32
    %c0_i32_0 = arith.constant 0 : i32
    %c0_i32_1 = arith.constant 0 : i32
    return %c0_i32, %c0_i32_0 : i32, i32
  }
  func.func @transform_2(%arg0: i32) -> (i32, i32) {
    %c0_i32 = arith.constant 0 : i32
    %c0_i32_0 = arith.constant 0 : i32
    %c0_i32_1 = arith.constant 0 : i32
    return %c0_i32, %c0_i32_0 : i32, i32
  }
  func.func @transform_3(%arg0: i32) -> (i32, i32) {
    %c0_i32 = arith.constant 0 : i32
    %c0_i32_0 = arith.constant 0 : i32
    %c0_i32_1 = arith.constant 0 : i32
    return %c0_i32, %c0_i32_0 : i32, i32
  }
  func.func @transform_4(%arg0: i32) -> (i32, i32) {
    %c0_i32 = arith.constant 0 : i32
    %c0_i32_0 = arith.constant 0 : i32
    %c0_i32_1 = arith.constant 0 : i32
    return %c0_i32, %c0_i32_0 : i32, i32
  }
  func.func @transform_5(%arg0: i32) -> (i32, i32) {
    %c0_i32 = arith.constant 0 : i32
    %c0_i32_0 = arith.constant 0 : i32
    return %arg0, %c0_i32 : i32, i32
  }
}

</mosaic_0001>

<bundles_post_ra>
// kernel: tpu_custom_call.1
= control target key start
LH: loop header
LB: loop body
LE: loop exit
PB: predicated region body
PF: predicated region fallthrough
CT: control target
= control target key end

     0   :  { %10 = vsyncpa [#allocation3], 0  ;;  %s555_s0 = inlined_call_operand.hbm [shape: bf16[8,32], index: 0, kind: input, shape index: {}]   ;;  %s556_s1 = inlined_call_operand.hbm [shape: bf16[32,128], index: 1, kind: input, shape index: {}]   ;;  %s557_s2 = inlined_call_operand.vmem [shape: f32[1,128], index: 2, kind: input, shape index: {}]   ;;  %s558_s3 = inlined_call_operand.hbm [shape: bf16[128,256], index: 3, kind: input, shape index: {}]   ;;  %s559_s4 = inlined_call_operand.vmem [shape: f32[1,256], index: 4, kind: input, shape index: {}]   ;;  %s560_s5 = inlined_call_operand.hbm [shape: f32[8,256], index: 5, kind: output, shape index: {}]  }
   0x1   :  { %11 = vsyncpa [#allocation6], 0 }
   0x2   :  { %12 = vsyncpa [#allocation4], 0  ;;  %s460_s18 = smov [#allocation5]   ;;  %s366_s22 = scalar_lea.hbm %s556_s1, 256 }
   0x3   :  { %s28_s19 = sshll.u32 %s460_s18, 4  ;;  %p367_p0 = scmp.ne.s32.totalorder %s556_s1, %s366_s22  ;;  %s29_s19 = int_to_ptr.vmem [resolvable:$true] %s28_s19 }
   0x4   :  { %p370_p1 = scmp.lt.u32.totalorder %s366_s22, %s556_s1 }
   0x6   :  { %p372_p2 = pnand %p370_p1, %p367_p0 }
   0x8   :  { %375 = shalt.err (!%p372_p2)
}
   0x9   :  { %s376_s27 = scalar_lea.vmem %s29_s19, 256  ;;  %p381_p4 = scmp.lt.s32.totalorder %s29_s19, %s29_s19 }
   0xa   :  { %p377_p3 = scmp.ne.s32.totalorder %s29_s19, %s376_s27  ;;  %p382_p5 = scmp.lt.s32.totalorder %s376_s27, %s376_s27 }
   0xc   :  { %p383_p6 = por %p382_p5, %p381_p4 }
   0xe   :  { %p384_p7 = pnand %p383_p6, %p377_p3 }
  0x10   :  { %387 = shalt.err (!%p384_p7)
}
  0x11   :  { %s461_s28 = smov 64   ;;  %s462_s29 = smov 4  }
  0x12   :  { %34 = dma.hbm_to_vmem [thread:$0]  %s556_s1, 256, %s29_s19, [#allocation6], %s461_s28, %s461_s28, %s462_s29  }
  0x13   :  { %s463_s7 = smov [#allocation2]   ;;  %s464_s9 = smov [#allocation7]  }
  0x14   :  { %s19_s8 = sshll.u32 %s463_s7, 4  ;;  %s42_s10 = sshll.u32 %s464_s9, 4  ;;  %s20_s8 = int_to_ptr.vmem [resolvable:$true] %s19_s8  ;;  %s43_s10 = int_to_ptr.vmem [resolvable:$true] %s42_s10 }
  0x15   :  { %s388_s13 = scalar_lea.hbm %s555_s0, 64 }
  0x16   :  { %p389_p8 = scmp.ne.s32.totalorder %s555_s0, %s388_s13  ;;  %p392_p9 = scmp.lt.u32.totalorder %s388_s13, %s555_s0 }
  0x18   :  { %p394_p10 = pnand %p392_p9, %p389_p8 }
  0x1a   :  { %397 = shalt.err (!%p394_p10)
}
  0x1b   :  { %s398_s1 = scalar_lea.vmem %s20_s8, 64  ;;  %p403_p12 = scmp.lt.s32.totalorder %s20_s8, %s20_s8 }
  0x1c   :  { %p399_p11 = scmp.ne.s32.totalorder %s20_s8, %s398_s1  ;;  %p404_p13 = scmp.lt.s32.totalorder %s398_s1, %s398_s1 }
  0x1e   :  { %p405_p0 = por %p404_p13, %p403_p12 }
  0x20   :  { %p406_p1 = pnand %p405_p0, %p399_p11 }
  0x22   :  { %409 = shalt.err (!%p406_p1)
}
  0x23   :  { %22 = dma.hbm_to_vmem [thread:$0]  %s555_s0, 64, %s20_s8, [#allocation3]  }
  0x24   :  { %s410_s22 = scalar_lea.hbm %s558_s3, 2048 }
  0x25   :  { %p411_p2 = scmp.ne.s32.totalorder %s558_s3, %s410_s22  ;;  %p414_p3 = scmp.lt.u32.totalorder %s410_s22, %s558_s3 }
  0x27   :  { %p416_p4 = pnand %p414_p3, %p411_p2 }
  0x29   :  { %419 = shalt.err (!%p416_p4)
}
  0x2a   :  { %s420_s27 = scalar_lea.vmem %s43_s10, 2048  ;;  %p425_p6 = scmp.lt.s32.totalorder %s43_s10, %s43_s10 }
  0x2b   :  { %p421_p5 = scmp.ne.s32.totalorder %s43_s10, %s420_s27  ;;  %p426_p7 = scmp.lt.s32.totalorder %s420_s27, %s420_s27 }
  0x2d   :  { %p427_p8 = por %p426_p7, %p425_p6 }
  0x2f   :  { %p428_p9 = pnand %p427_p8, %p421_p5 }
  0x31   :  { %431 = shalt.err (!%p428_p9)
}
  0x32   :  { %s465_s0 = smov 128   ;;  %s466_s28 = smov 8  }
  0x33   :  { %48 = dma.hbm_to_vmem [thread:$0]  %s558_s3, 2048, %s43_s10, [#allocation6], %s465_s0, %s465_s0, %s466_s28  }
  0x34   :  { %454 = dma.done.wait [#allocation3], 64  }
  0x35   :  { %455 = vsyncadd [#allocation3], 4294967232 }
  0x36   :  { %456 = dma.done.wait [#allocation6], 2304  }
  0x37   :  { %457 = vsyncadd [#allocation6], 4294964992  ;;  %v467_v0 = vmov 0.0   ;;  %vm468_vm0 = vmmov 0   ;;  %v340_v1 = vld [vmem:[#allocation5] sm:$0xff]   ;;  %v341_v2 = vld [vmem:[#allocation5 + $0x8] sm:$0xff]   ;;  %v149_v29 = vlaneseq }
  0x38   :  { %321 = vmatprep.subr.bf16.mxu0 %v467_v0  ;;  %325 = vmatprep.mubr.msk.bf16.mxu0 %vm468_vm0, %v467_v0  ;;  %v342_v3 = vld [vmem:[#allocation7 + $0x4] ss:$8 sps:$4 sm:$0xff]   ;;  %v344_v4 = vld [vmem:[#allocation7] ss:$8 sps:$4 sm:$0xff]   ;;  %v345_v5 = vld [vmem:[#allocation7 + $0x14] ss:$8 sps:$4 sm:$0xff]  }
  0x39   :  { %322 = vmatpush3.bf16.msra.mxu0 %v340_v1  ;;  %v61_v6 = vld [vmem:[#allocation2] sm:$0xf]  ;;  %239 = vmatprep.subr.bf16.mxu1 %v342_v3  ;;  %vm85_vm1 = vcmask 261120   ;;  %v347_v7 = vld [vmem:[#allocation7 + $0x10] ss:$8 sps:$4 sm:$0xff]   ;;  %v469_v20 = vmov 0  }
  0x3a   :  { %323 = vmatprep.subr.bf16.mxu0 %v467_v0  ;;  %240 = vmatpush1.bf16.msra.mxu1 %v344_v4  ;;  %v348_v8 = vld [vmem:[#allocation7 + $0x24] ss:$8 sps:$4 sm:$0xff]   ;;  %v350_v9 = vld [vmem:[#allocation7 + $0x20] ss:$8 sps:$4 sm:$0xff]   ;;  %v351_v10 = vld [vmem:[#allocation7 + $0x34] ss:$8 sps:$4 sm:$0xff]  }
  0x3b   :  { %241 = vmatprep.subr.bf16.mxu1 %v345_v5  ;;  %v353_v11 = vld [vmem:[#allocation7 + $0x30] ss:$8 sps:$4 sm:$0xff]   ;;  %v354_v12 = vld [vmem:[#allocation7 + $0x44] ss:$8 sps:$4 sm:$0xff]   ;;  %v356_v13 = vld [vmem:[#allocation7 + $0x40] ss:$8 sps:$4 sm:$0xff]   ;;  %271 = vmatprep.mubr.bf16.mxu1 %v469_v20 }
  0x3c   :  { %v357_v14 = vld [vmem:[#allocation7 + $0x54] ss:$8 sps:$4 sm:$0xff]   ;;  %v359_v15 = vld [vmem:[#allocation7 + $0x50] ss:$8 sps:$4 sm:$0xff]   ;;  %v360_v16 = vld [vmem:[#allocation7 + $0x64] ss:$8 sps:$4 sm:$0xff]  }
  0x3d   :  { %324 = vmatpush3.bf16.msra.mxu0 %v341_v2  ;;  %v362_v17 = vld [vmem:[#allocation7 + $0x60] ss:$8 sps:$4 sm:$0xff]   ;;  %v363_v18 = vld [vmem:[#allocation7 + $0x74] ss:$8 sps:$4 sm:$0xff]   ;;  %v365_v19 = vld [vmem:[#allocation7 + $0x70] ss:$8 sps:$4 sm:$0xff]  }
  0x3e   :  { %242 = vmatpush1.bf16.msra.mxu1 %v347_v7  ;;  %v298_v21 = vld [vmem:[%s557_s2] ss:$0 sm:$0xff]  ;;  %v150_v30 = vshrl.u32 %v149_v29, 7  ;;  %s470_s9 = smov [#allocation8]  }
  0x3f   :  { %243 = vmatprep.subr.bf16.mxu1 %v348_v8  ;;  %v147_v32 = vld [vmem:[%s559_s4] sm:$0x3]  ;;  %s288_s2 = sshll.u32 %s470_s9, 4  ;;  %s289_s2 = int_to_ptr.vmem [resolvable:$true] %s288_s2 }
  0x40   :  { %326 = vmatmul.mubr.msk.bf16.vlgmr.msra.gmra.mrb[0].mxu0 %vm85_vm1, %v61_v6  ;;  %v151_v31 = vsub.s32 0, %v150_v30  ;;  %v155_v33 = vsub.s32 1, %v150_v30  ;;  %s432_s10 = scalar_lea.vmem %s289_s2, 256  ;;  %p437_p11 = scmp.lt.s32.totalorder %s289_s2, %s289_s2 }
  0x41   :  { %p433_p10 = scmp.ne.s32.totalorder %s289_s2, %s432_s10  ;;  %p438_p12 = scmp.lt.s32.totalorder %s432_s10, %s432_s10 }
  0x42   :  { %244 = vmatpush1.bf16.msra.mxu1 %v350_v9  ;;  %v152_v34 = vrot.slane %v147_v32, %v151_v31  ;;  %v156_v35 = vrot.slane %v147_v32, %v155_v33 }
  0x43   :  { %245 = vmatprep.subr.bf16.mxu1 %v351_v10  ;;  %p439_p13 = por %p438_p12, %p437_p11 }
  0x45   :  { %p440_p0 = pnand %p439_p13, %p433_p10 }
  0x46   :  { %246 = vmatpush1.bf16.msra.mxu1 %v353_v11 }
  0x47   :  { %247 = vmatprep.subr.bf16.mxu1 %v354_v12 }
  0x4a   :  { %248 = vmatpush1.bf16.msra.mxu1 %v356_v13 }
  0x4b   :  { %249 = vmatprep.subr.bf16.mxu1 %v357_v14 }
  0x4e   :  { %250 = vmatpush1.bf16.msra.mxu1 %v359_v15 }
  0x4f   :  { %251 = vmatprep.subr.bf16.mxu1 %v360_v16 }
  0x52   :  { %252 = vmatpush1.bf16.msra.mxu1 %v362_v17 }
  0x53   :  { %253 = vmatprep.subr.bf16.mxu1 %v363_v18 }
  0x56   :  { %254 = vmatpush1.bf16.msra.mxu1 %v365_v19 }
 0x113   :  { %v123_v22 = vpop.f32.mrb[0].mxu0 }
 0x114   :  { %v124_v23 = vadd.f32 %v298_v21, %v123_v22  ;;  %v327_v24 = vpop.f32.mrb[1].mxu0 }
 0x115   :  { %v126_v25 = vpop.f32.mrb[2].mxu0 }
 0x116   :  { %v129_v26 = vmax.f32 %v124_v23, 0.0  ;;  %v328_v27 = vpop.f32.mrb[3].mxu0 }
 0x118   :  { %v130_v28 = vpack.c.bf16 %v129_v26, %v129_v26 }
 0x11a   :  { %272 = vmatmul.mubr.bf16.vlgmr.msra.gmra.mrb[0].mxu1 %v130_v28 }
 0x1ed   :  { %v273_v36 = vpop.f32.mrb[0].mxu1 }
 0x1ee   :  { %v274_v37 = vadd.f32 %v273_v36, %v152_v34  ;;  %v275_v38 = vpop.f32.mrb[1].mxu1 }
 0x1ef   :  { %v276_v39 = vadd.f32 %v275_v38, %v156_v35  ;;  %v277_v40 = vpop.f32.mrb[2].mxu1 }
 0x1f0   :  { %280 = vst [vmem:[#allocation8] sm:$0xff] %v274_v37  ;;  %v278_v41 = vpop.f32.mrb[3].mxu1 }
 0x1f1   :  { %281 = vst [vmem:[#allocation8 + $0x8] sm:$0xff] %v276_v39 }
 0x1f2   :  { %443 = shalt.err (!%p440_p0)
}
 0x1f3   :  { %s444_s12 = scalar_lea.hbm %s560_s5, 256 }
 0x1f4   :  { %p445_p1 = scmp.ne.s32.totalorder %s560_s5, %s444_s12  ;;  %p448_p2 = scmp.lt.u32.totalorder %s444_s12, %s560_s5 }
 0x1f6   :  { %p450_p3 = pnand %p448_p2, %p445_p1 }
 0x1f8   :  { %453 = shalt.err (!%p450_p3)
}
 0x1f9   :  { %291 = dma.vmem_to_hbm [thread:$0]  %s289_s2, 256, %s560_s5, [#allocation4]  }
 0x1fa   :  { %458 = dma.done.wait [#allocation4], 256  }
 0x1fb   :  { %459 = vsyncadd [#allocation4], 4294967040 }
 0x1fc   :  { %295 = vsyncpa [#allocation3], 1 }
 0x1fd   :  { %296 = vsyncpa [#allocation6], 1 }
 0x1fe   :  { %297 = vsyncpa [#allocation4], 1 }

</bundles_post_ra>
